<compile_context>
chip_gen: v6e
topology: v6e:2x2x1
jax: 0.10.0
libtpu: 0.0.40
codegen_flags: <defaults>
</compile_context>

<pallas_src>
import functools

import jax
import jax.numpy as jnp
from jax.experimental import pallas as pl
from jax.experimental.pallas import tpu as pltpu


_LANE = 128                      # lane width: last block dim multiple
_MAX_BATCH_TILE = 8              # static per-image unroll bound in the kernel
_VMEM_BLOCK_BUDGET = 24 << 20    # double-buffered x+out block budget (bytes)


def _outconv_kernel(x_ref, w_ref, b_ref, o_ref, *, precision):
    """One (batch-tile, HW-strip) block per grid step.

    x_ref : (Bt, Cin, S)   pixels on lanes (S is a multiple of 128)
    w_ref : (Cout, Cin)    1x1 conv weight
    b_ref : (Cout, 1)      conv bias (f32), broadcast over the lane axis
    o_ref : (Bt, Cout, S)  output block (lane-dense store)
    """
    w = w_ref[...]
    b = b_ref[...]
    # Bt is a small static block dim; an unrolled per-image MXU dot keeps the
    # pixel axis lane-dense with no in-kernel transposes.
    for i in range(x_ref.shape[0]):
        y = jnp.dot(w, x_ref[i],
                    preferred_element_type=jnp.float32,
                    precision=precision)
        o_ref[i] = (y + b).astype(o_ref.dtype)


def _choose_tiles(n, cin, cout, hw_pad, in_itemsize, out_itemsize):
    """Pick (batch_tile, hw_strip): the largest lane-dense blocks whose
    double-buffered x+out footprint stays under the VMEM budget."""
    bt = min(n, _MAX_BATCH_TILE)
    per_pixel = cin * in_itemsize + cout * out_itemsize

    def fits(bt_, strip_):
        return 2 * bt_ * strip_ * per_pixel <= _VMEM_BLOCK_BUDGET

    # Largest multiple of 128 that divides hw_pad and fits the budget.
    k = hw_pad // _LANE
    strip = _LANE
    for d in range(1, k + 1):
        if k % d == 0 and fits(bt, d * _LANE):
            strip = d * _LANE
    # If even a single 128-wide strip is too big (very large Cin+Cout),
    # shrink the batch tile instead.
    while bt > 1 and not fits(bt, strip):
        bt -= 1
    return bt, strip


def out_conv(x_nchw, w, b, *, bf16_inputs=False):
    """OutConv forward.

    x_nchw : (N, Cin, H, W) float32
    w      : (Cout, Cin, 1, 1)  torch Conv2d weight layout
    b      : (Cout,)            torch Conv2d bias
    bf16_inputs : cast x and w to bf16 (halves HBM read bytes on v6e/v7x);
                  accumulation and bias add stay f32, output dtype unchanged.
    returns: (N, Cout, H, W)
    """
    N, Cin, H, W = x_nchw.shape
    Cout = w.shape[0]
    HW = H * W
    out_dtype = x_nchw.dtype

    # Free (contiguous) reshapes only — no transposes for a 1x1 conv when the
    # pixel axis stays on lanes.
    x_flat = x_nchw.reshape(N, Cin, HW)
    w_mat = w.reshape(Cout, Cin)
    b_col = b.reshape(Cout, 1).astype(jnp.float32)

    if bf16_inputs:
        x_flat = x_flat.astype(jnp.bfloat16)
        w_mat = w_mat.astype(jnp.bfloat16)
        precision = jax.lax.Precision.DEFAULT
    else:
        # Strict float32 parity with torch nn.Conv2d at any Cin.
        precision = jax.lax.Precision.HIGHEST

    in_itemsize = jnp.dtype(x_flat.dtype).itemsize
    out_itemsize = jnp.dtype(out_dtype).itemsize

    # --- lane-density guard: pad the pixel axis to a multiple of 128 -------
    hw_pad = pl.cdiv(HW, _LANE) * _LANE
    if hw_pad != HW:
        x_flat = jnp.pad(x_flat, ((0, 0), (0, 0), (0, hw_pad - HW)))

    # --- batch tile + HW strip selection ------------------------------------
    bt, strip = _choose_tiles(N, Cin, Cout, hw_pad, in_itemsize, out_itemsize)
    n_pad = pl.cdiv(N, bt) * bt
    if n_pad != N:
        x_flat = jnp.pad(x_flat, ((0, n_pad - N), (0, 0), (0, 0)))

    grid = (n_pad // bt, hw_pad // strip)

    # --- VMEM limit: cover the double-buffered blocks + weights + headroom --
    block_bytes = 2 * bt * strip * (Cin * in_itemsize + Cout * out_itemsize)
    vmem_needed = block_bytes + Cout * Cin * in_itemsize + Cout * 4
    vmem_limit = min(max(vmem_needed + (8 << 20), 32 << 20), 64 << 20)

    cost = pl.CostEstimate(
        flops=2 * N * Cin * Cout * HW,
        transcendentals=0,
        bytes_accessed=(N * HW * (Cin * in_itemsize + Cout * out_itemsize)
                        + Cout * Cin * in_itemsize + Cout * 4),
    )

    kernel = functools.partial(_outconv_kernel, precision=precision)

    out_flat = pl.pallas_call(
        kernel,
        out_shape=jax.ShapeDtypeStruct((n_pad, Cout, hw_pad), out_dtype),
        grid_spec=pltpu.PrefetchScalarGridSpec(
            num_scalar_prefetch=0,
            grid=grid,
            in_specs=[
                pl.BlockSpec((bt, Cin, strip), lambda n, s: (n, 0, s)),  # x
                pl.BlockSpec((Cout, Cin), lambda n, s: (0, 0)),          # weight
                pl.BlockSpec((Cout, 1), lambda n, s: (0, 0)),            # bias
            ],
            out_specs=pl.BlockSpec((bt, Cout, strip), lambda n, s: (n, 0, s)),
        ),
        compiler_params=pltpu.CompilerParams(
            dimension_semantics=("parallel", "parallel"),  # distinct out blocks
            vmem_limit_bytes=vmem_limit,
        ),
        cost_estimate=cost,
    )(x_flat, w_mat, b_col)

    # Strip batch / spatial padding (no-op when nothing was padded).
    out_flat = out_flat[:N, :, :HW]
    return out_flat.reshape(N, Cout, H, W)


def _reference(x, w, b):
    """Plain-JAX reference matching torch's nn.Conv2d(in_ch, out_ch, 1)."""
    y = jax.lax.conv_general_dilated(
        x, w, window_strides=(1, 1), padding=((0, 0), (0, 0)),
        dimension_numbers=("NCHW", "OIHW", "NCHW"),
        precision=jax.lax.Precision.HIGHEST)
    return y + b[None, :, None, None]


if __name__ == "__main__":
    key = jax.random.PRNGKey(0)
    k_x, k_w = jax.random.split(key)

    N, in_ch, out_ch, H, W = 2, 4, 8, 16, 16
    x = jax.random.normal(k_x, (N, in_ch, H, W), jnp.float32)
    w = jax.random.normal(k_w, (out_ch, in_ch, 1, 1), jnp.float32) * 0.1
    b = jnp.linspace(-0.1, 0.1, out_ch, dtype=jnp.float32)

    out = jax.block_until_ready(out_conv(x, w, b))
    ref = jax.block_until_ready(_reference(x, w, b))

    assert out.shape == (N, out_ch, H, W), out.shape
    assert jnp.allclose(out, ref, atol=1e-5, rtol=1e-5), (
        float(jnp.max(jnp.abs(out - ref))))
    print("KERNEL_OK")
</pallas_src>

<mosaic_0001>
module attributes {stable_mosaic.version = 11 : i64} {
  func.func @_outconv_kernel(%arg0: i32, %arg1: i32, %arg2: memref<2x4x256xf32, #tpu.memory_space<vmem>>, %arg3: memref<8x4xf32, #tpu.memory_space<vmem>>, %arg4: memref<8x1xf32, #tpu.memory_space<vmem>>, %arg5: memref<2x8x256xf32, #tpu.memory_space<vmem>>) attributes {dimension_semantics = [#tpu.dimension_semantics<parallel>, #tpu.dimension_semantics<parallel>], iteration_bounds = array<i64: 1, 1>, scalar_prefetch = 0 : i64, scratch_operands = 0 : i64, tpu.core_type = #tpu.core_type<tc>, window_params = [{transform_indices = @transform_0, window_bounds = array<i64: 2, 4, 256>}, {pipeline_mode = #tpu.pipeline_mode<synchronous>, transform_indices = @transform_1, window_bounds = array<i64: 8, 4>}, {pipeline_mode = #tpu.pipeline_mode<synchronous>, transform_indices = @transform_2, window_bounds = array<i64: 8, 1>}, {transform_indices = @transform_3, window_bounds = array<i64: 2, 8, 256>}]} {
    %c0 = arith.constant 0 : index
    %c0_0 = arith.constant 0 : index
    %0 = vector.load %arg3[%c0, %c0_0] : memref<8x4xf32, #tpu.memory_space<vmem>>, vector<8x4xf32>
    %c0_1 = arith.constant 0 : index
    %c0_2 = arith.constant 0 : index
    %1 = vector.load %arg4[%c0_1, %c0_2] : memref<8x1xf32, #tpu.memory_space<vmem>>, vector<8x1xf32>
    %c0_3 = arith.constant 0 : index
    %c0_4 = arith.constant 0 : index
    %c0_5 = arith.constant 0 : index
    %2 = vector.load %arg2[%c0_3, %c0_4, %c0_5] : memref<2x4x256xf32, #tpu.memory_space<vmem>>, vector<1x4x256xf32>
    %3 = vector.shape_cast %2 : vector<1x4x256xf32> to vector<4x256xf32>
    %cst = arith.constant dense<0.000000e+00> : vector<8x256xf32>
    %4 = tpu.matmul %0, %3, %cst {dimension_numbers = #tpu.dot_dimension_numbers<[1], [0], [0], [1], [0, 0, 1, 1], [], []>, precision = #tpu.contract_precision<fp32>} : vector<8x4xf32>, vector<4x256xf32>, vector<8x256xf32> -> vector<8x256xf32>
    %5 = vector.broadcast %1 : vector<8x1xf32> to vector<8x256xf32>
    %6 = arith.addf %4, %5 : vector<8x256xf32>
    %c0_6 = arith.constant 0 : index
    %c0_7 = arith.constant 0 : index
    %c0_8 = arith.constant 0 : index
    %7 = vector.load %arg5[%c0_6, %c0_7, %c0_8] : memref<2x8x256xf32, #tpu.memory_space<vmem>>, vector<1x8x256xf32>
    %8 = vector.shape_cast %7 : vector<1x8x256xf32> to vector<8x256xf32>
    %9 = vector.shape_cast %6 : vector<8x256xf32> to vector<1x8x256xf32>
    tpu.vector_store %arg5[%c0_6, %c0_7, %c0_8], %9 {strides = array<i32>} : memref<2x8x256xf32, #tpu.memory_space<vmem>>, vector<1x8x256xf32>,
    %c1 = arith.constant 1 : index
    %c0_9 = arith.constant 0 : index
    %c0_10 = arith.constant 0 : index
    %10 = vector.load %arg2[%c1, %c0_9, %c0_10] : memref<2x4x256xf32, #tpu.memory_space<vmem>>, vector<1x4x256xf32>
    %11 = vector.shape_cast %10 : vector<1x4x256xf32> to vector<4x256xf32>
    %cst_11 = arith.constant dense<0.000000e+00> : vector<8x256xf32>
    %12 = tpu.matmul %0, %11, %cst_11 {dimension_numbers = #tpu.dot_dimension_numbers<[1], [0], [0], [1], [0, 0, 1, 1], [], []>, precision = #tpu.contract_precision<fp32>} : vector<8x4xf32>, vector<4x256xf32>, vector<8x256xf32> -> vector<8x256xf32>
    %13 = vector.broadcast %1 : vector<8x1xf32> to vector<8x256xf32>
    %14 = arith.addf %12, %13 : vector<8x256xf32>
    %c1_12 = arith.constant 1 : index
    %c0_13 = arith.constant 0 : index
    %c0_14 = arith.constant 0 : index
    %15 = vector.load %arg5[%c1_12, %c0_13, %c0_14] : memref<2x8x256xf32, #tpu.memory_space<vmem>>, vector<1x8x256xf32>
    %16 = vector.shape_cast %15 : vector<1x8x256xf32> to vector<8x256xf32>
    %17 = vector.shape_cast %14 : vector<8x256xf32> to vector<1x8x256xf32>
    tpu.vector_store %arg5[%c1_12, %c0_13, %c0_14], %17 {strides = array<i32>} : memref<2x8x256xf32, #tpu.memory_space<vmem>>, vector<1x8x256xf32>,
    return
  }
  func.func @transform_0(%arg0: i32, %arg1: i32) -> (i32, i32, i32) {
    %c0_i32 = arith.constant 0 : i32
    %c0_i32_0 = arith.constant 0 : i32
    return %arg0, %c0_i32, %arg1 : i32, i32, i32
  }
  func.func @transform_1(%arg0: i32, %arg1: i32) -> (i32, i32) {
    %c0_i32 = arith.constant 0 : i32
    %c0_i32_0 = arith.constant 0 : i32
    %c0_i32_1 = arith.constant 0 : i32
    return %c0_i32, %c0_i32_0 : i32, i32
  }
  func.func @transform_2(%arg0: i32, %arg1: i32) -> (i32, i32) {
    %c0_i32 = arith.constant 0 : i32
    %c0_i32_0 = arith.constant 0 : i32
    %c0_i32_1 = arith.constant 0 : i32
    return %c0_i32, %c0_i32_0 : i32, i32
  }
  func.func @transform_3(%arg0: i32, %arg1: i32) -> (i32, i32, i32) {
    %c0_i32 = arith.constant 0 : i32
    %c0_i32_0 = arith.constant 0 : i32
    return %arg0, %c0_i32, %arg1 : i32, i32, i32
  }
}

</mosaic_0001>

<bundles_post_ra>
// kernel: tpu_custom_call.1
= control target key start
LH: loop header
LB: loop body
LE: loop exit
PB: predicated region body
PF: predicated region fallthrough
CT: control target
= control target key end

     0   :  { %vm29_vm0 = vcmask 1043456   ;;  %vm25_vm1 = vcmask 31744   ;;  %v1024_v5 = vmov 0.0   ;;  %s1089_s0 = inlined_call_operand.vmem [shape: f32[2,4,256], index: 0, kind: input, shape index: {}]   ;;  %s1090_s1 = inlined_call_operand.vmem [shape: f32[8,4], index: 1, kind: input, shape index: {}]   ;;  %s1091_s2 = inlined_call_operand.vmem [shape: f32[8,1], index: 2, kind: input, shape index: {}]   ;;  %s1092_s3 = inlined_call_operand.hbm [shape: f32[2,8,256], index: 3, kind: output, shape index: {}]  }
   0x1   :  { %v17_v0 = vld [vmem:[%s1089_s0] sm:$0xff]  ;;  %v993_v2 = vld [vmem:[%s1089_s0 + $0x8] sm:$0xff]  ;;  %100 = vmatprep.mubr.f32.mxu0 %v1024_v5  ;;  %186 = vmatprep.mubr.f32.mxu1 %v1024_v5 }
   0x2   :  { %v15_v1 = vld [vmem:[%s1090_s1] sm:$0xff]  ;;  %v24_v3 = vcombine.high %v17_v0, %v17_v0  ;;  %v30_v4 = vsel %vm29_vm0, %v17_v0, 0  ;;  %v504_v7 = vcombine.high %v993_v2, %v993_v2 }
   0x3   :  { %v27_v6 = vsel %vm25_vm1, %v15_v1, 0  ;;  %v16_v8 = vld [vmem:[%s1091_s2] sm:$0xff] }
   0x4   :  { %8 = vsyncpa [#allocation3], 0  ;;  %v66_v9 = vand.u32 4294901760, %v30_v4  ;;  %v1064_v10 = vand.u32 4294901760, %v27_v6  ;;  %v505_v11 = vsel %vm29_vm0, %v993_v2, 0  ;;  %v32_v12 = vsel %vm29_vm0, %v24_v3, 0 }
   0x5   :  { %v507_v13 = vsel %vm29_vm0, %v504_v7, 0  ;;  %v1025_v14 = vmov 0   ;;  %v64_v15 = vand.u32 4294901760, %v32_v12  ;;  %v541_v19 = vand.u32 4294901760, %v505_v11  ;;  %s1026_s0 = smov [#allocation2]  }
   0x6   :  { %999 = vset.pattern.permute.xlu0 %v1025_v14  ;;  %v102_v16 = vsub.f32 %v27_v6, %v1064_v10  ;;  %v149_v17 = vsub.f32 %v30_v4, %v66_v9  ;;  %v539_v18 = vand.u32 4294901760, %v507_v13  ;;  %s982_s1 = sshll.u32 %s1026_s0, 4  ;;  %s983_s1 = int_to_ptr.vmem [resolvable:$true] %s982_s1 }
   0x7   :  { %20 = vperm.xlu0 %999, %v16_v8   ;;  %65 = vmatprep.subr.mxu0 %v64_v15  ;;  %v143_v21 = vsub.f32 %v32_v12, %v64_v15  ;;  %v624_v27 = vsub.f32 %v505_v11, %v541_v19  ;;  %s1002_s2 = scalar_lea.vmem %s983_s1, 512  ;;  %p1007_p1 = scmp.lt.s32.totalorder %s983_s1, %s983_s1 }
   0x8   :  { %v103_v20 = vand.u32 4294901760, %v102_v16  ;;  %v150_v22 = vand.u32 4294901760, %v149_v17  ;;  %67 = vmatpush1.msra.mxu0 %v66_v9  ;;  %v618_v23 = vsub.f32 %v507_v13, %v539_v18  ;;  %p1003_p0 = scmp.ne.s32.totalorder %s983_s1, %s1002_s2  ;;  %p1008_p2 = scmp.lt.s32.totalorder %s1002_s2, %s1002_s2 }
   0x9   :  { %v144_v25 = vand.u32 4294901760, %v143_v21  ;;  %226 = vmatprep.subr.mxu0 %v143_v21  ;;  %v625_v33 = vand.u32 4294901760, %v624_v27 }
   0xa   :  { %v104_v24 = vsub.f32 %v102_v16, %v103_v20  ;;  %v151_v26 = vsub.f32 %v149_v17, %v150_v22  ;;  %v619_v31 = vand.u32 4294901760, %v618_v23  ;;  %p1009_p3 = por %p1008_p2, %p1007_p1 }
   0xb   :  { %v145_v29 = vsub.f32 %v143_v21, %v144_v25  ;;  %v626_v35 = vsub.f32 %v624_v27, %v625_v33 }
   0xc   :  { %v105_v28 = vand.u32 4294901760, %v104_v24  ;;  %v152_v30 = vand.u32 4294901760, %v151_v26  ;;  %v620_v34 = vsub.f32 %v618_v23, %v619_v31  ;;  %p1010_p4 = pnand %p1009_p3, %p1003_p0 }
   0xd   :  { %v146_v32 = vand.u32 4294901760, %v145_v29  ;;  %v627_v37 = vand.u32 4294901760, %v626_v35 }
   0xe   :  { %106 = vmatmul.mubr.f32.vlgmr.msra.gmra.mxu0 %v105_v28  ;;  %v621_v36 = vand.u32 4294901760, %v620_v34 }
   0xf   :  { %229 = vmatpush1.msra.mxu0 %v149_v17  ;;  %262 = vmatprep.mubr.f32.mxu0 %v1024_v5 }
  0x10   :  { %147 = vmatprep.subr.mxu1 %v146_v32  ;;  %380 = vmatprep.subr.mxu0 %v144_v25 }
  0x11   :  { %153 = vmatpush1.msra.mxu1 %v152_v30 }
  0x12   :  { %188 = vmatmul.mubr.f32.vlgmr.msra.gmra.mxu1 %v1064_v10  ;;  %302 = vmatprep.subr.mxu1 %v64_v15 }
  0x13   :  { %265 = vmatmul.mubr.f32.vlgmr.msra.gmra.mxu0 %v102_v16  ;;  %304 = vmatpush1.msra.mxu1 %v66_v9 }
  0x14   :  { %337 = vmatprep.mubr.f32.mxu1 %v1024_v5  ;;  %384 = vmatpush1.msra.mxu0 %v150_v22 }
  0x15   :  { %417 = vmatprep.mubr.f32.mxu0 %v1024_v5  ;;  %456 = vmatprep.subr.mxu1 %v64_v15 }
  0x16   :  { %341 = vmatmul.mubr.f32.vlgmr.msra.gmra.mxu1 %v103_v20  ;;  %540 = vmatprep.subr.mxu0 %v539_v18 }
  0x17   :  { %419 = vmatmul.mubr.f32.vlgmr.msra.gmra.mxu0 %v1064_v10  ;;  %458 = vmatpush1.msra.mxu1 %v66_v9 }
  0x18   :  { %491 = vmatprep.mubr.f32.mxu1 %v1024_v5  ;;  %542 = vmatpush1.msra.mxu0 %v541_v19 }
  0x19   :  { %575 = vmatprep.mubr.f32.mxu0 %v1024_v5  ;;  %622 = vmatprep.subr.mxu1 %v621_v36 }
  0x1a   :  { %493 = vmatmul.mubr.f32.vlgmr.msra.gmra.mxu1 %v1064_v10  ;;  %701 = vmatprep.subr.mxu0 %v618_v23 }
  0x1b   :  { %581 = vmatmul.mubr.f32.vlgmr.msra.gmra.mxu0 %v105_v28  ;;  %628 = vmatpush1.msra.mxu1 %v627_v37 }
  0x1c   :  { %661 = vmatprep.mubr.f32.mxu1 %v1024_v5  ;;  %704 = vmatpush1.msra.mxu0 %v624_v27 }
  0x1d   :  { %737 = vmatprep.mubr.f32.mxu0 %v1024_v5  ;;  %777 = vmatprep.subr.mxu1 %v539_v18 }
  0x1e   :  { %663 = vmatmul.mubr.f32.vlgmr.msra.gmra.mxu1 %v1064_v10  ;;  %855 = vmatprep.subr.mxu0 %v619_v31 }
  0x1f   :  { %740 = vmatmul.mubr.f32.vlgmr.msra.gmra.mxu0 %v102_v16  ;;  %779 = vmatpush1.msra.mxu1 %v541_v19 }
  0x20   :  { %812 = vmatprep.mubr.f32.mxu1 %v1024_v5  ;;  %859 = vmatpush1.msra.mxu0 %v625_v33 }
  0x21   :  { %892 = vmatprep.mubr.f32.mxu0 %v1024_v5  ;;  %931 = vmatprep.subr.mxu1 %v539_v18 }
  0x22   :  { %816 = vmatmul.mubr.f32.vlgmr.msra.gmra.mxu1 %v103_v20 }
  0x23   :  { %894 = vmatmul.mubr.f32.vlgmr.msra.gmra.mxu0 %v1064_v10  ;;  %933 = vmatpush1.msra.mxu1 %v541_v19 }
  0x24   :  { %966 = vmatprep.mubr.f32.mxu1 %v1024_v5 }
  0x26   :  { %968 = vmatmul.mubr.f32.vlgmr.msra.gmra.mxu1 %v1064_v10 }
  0x82   :  { %v21_v38 = vpop.permute.xlu0 %20 }
  0xce   :  { %v107_v39 = vpop.f32.mrf.mxu0 }
  0xcf   :  { %v108_v40 = vadd.f32 %v107_v39, %v21_v38 }
  0xd0   :  { %v109_v41 = vpop.f32.mrf.mxu0 }
  0xd1   :  { %v110_v43 = vadd.f32 %v109_v41, %v21_v38 }
  0xd2   :  { %v189_v42 = vpop.f32.mrf.mxu1 }
  0xd3   :  { %v190_v44 = vadd.f32 %v189_v42, %v108_v40  ;;  %v266_v45 = vpop.f32.mrf.mxu0 }
  0xd4   :  { %v191_v46 = vpop.f32.mrf.mxu1 }
  0xd5   :  { %v267_v47 = vadd.f32 %v266_v45, %v190_v44  ;;  %v192_v48 = vadd.f32 %v191_v46, %v110_v43  ;;  %v268_v49 = vpop.f32.mrf.mxu0 }
  0xd6   :  { %v342_v50 = vpop.f32.mrf.mxu1 }
  0xd7   :  { %v269_v51 = vadd.f32 %v268_v49, %v192_v48  ;;  %v343_v52 = vadd.f32 %v342_v50, %v267_v47  ;;  %v420_v53 = vpop.f32.mrf.mxu0 }
  0xd8   :  { %v344_v54 = vpop.f32.mrf.mxu1 }
  0xd9   :  { %v421_v55 = vadd.f32 %v420_v53, %v343_v52  ;;  %v345_v56 = vadd.f32 %v344_v54, %v269_v51  ;;  %v422_v57 = vpop.f32.mrf.mxu0 }
  0xda   :  { %v494_v58 = vpop.f32.mrf.mxu1 }
  0xdb   :  { %v423_v59 = vadd.f32 %v422_v57, %v345_v56  ;;  %v495_v60 = vadd.f32 %v494_v58, %v421_v55  ;;  %v582_v61 = vpop.f32.mrf.mxu0 }
  0xdc   :  { %v583_v62 = vadd.f32 %v582_v61, %v21_v38  ;;  %v496_v63 = vpop.f32.mrf.mxu1 }
  0xdd   :  { %499 = vst [vmem:[#allocation2] sm:$0xff] %v495_v60  ;;  %v497_v0 = vadd.f32 %v496_v63, %v423_v59  ;;  %v584_v1 = vpop.f32.mrf.mxu0 }
  0xde   :  { %v664_v2 = vpop.f32.mrf.mxu1  ;;  %v585_v3 = vadd.f32 %v584_v1, %v21_v38 }
  0xdf   :  { %500 = vst [vmem:[#allocation2 + $0x8] sm:$0xff] %v497_v0  ;;  %v665_v4 = vadd.f32 %v664_v2, %v583_v62  ;;  %v741_v5 = vpop.f32.mrf.mxu0 }
  0xe0   :  { %v666_v6 = vpop.f32.mrf.mxu1 }
  0xe1   :  { %v742_v7 = vadd.f32 %v741_v5, %v665_v4  ;;  %v667_v8 = vadd.f32 %v666_v6, %v585_v3  ;;  %v743_v9 = vpop.f32.mrf.mxu0 }
  0xe2   :  { %v817_v10 = vpop.f32.mrf.mxu1 }
  0xe3   :  { %v744_v11 = vadd.f32 %v743_v9, %v667_v8  ;;  %v818_v12 = vadd.f32 %v817_v10, %v742_v7  ;;  %v895_v13 = vpop.f32.mrf.mxu0 }
  0xe4   :  { %v819_v14 = vpop.f32.mrf.mxu1 }
  0xe5   :  { %v896_v15 = vadd.f32 %v895_v13, %v818_v12  ;;  %v820_v16 = vadd.f32 %v819_v14, %v744_v11  ;;  %v897_v17 = vpop.f32.mrf.mxu0 }
  0xe6   :  { %v969_v18 = vpop.f32.mrf.mxu1 }
  0xe7   :  { %v898_v19 = vadd.f32 %v897_v17, %v820_v16  ;;  %v970_v20 = vadd.f32 %v969_v18, %v896_v15 }
  0xe8   :  { %v971_v21 = vpop.f32.mrf.mxu1 }
  0xe9   :  { %975 = vst [vmem:[#allocation2 + $0x10] sm:$0xff] %v970_v20  ;;  %v972_v22 = vadd.f32 %v971_v21, %v898_v19 }
  0xeb   :  { %976 = vst [vmem:[#allocation2 + $0x18] sm:$0xff] %v972_v22 }
  0xec   :  { %1013 = shalt.err (!%p1010_p4)
}
  0xed   :  { %s1027_s20 = smov 256   ;;  %s1028_s21 = smov 16  }
  0xee   :  { %988 = dma.vmem_to_hbm [thread:$0]  %s983_s1, 512, %s1092_s3, [#allocation3], %s1027_s20, %s1027_s20, %s1028_s21  }
  0xef   :  { %1022 = dma.done.wait [#allocation3], 512  }
  0xf0   :  { %1023 = vsyncadd [#allocation3], 4294966784 }
  0xf1   :  { %992 = vsyncpa [#allocation3], 1 }

</bundles_post_ra>
